<compile_context>
chip_gen: v6e
topology: v6e:2x2x1
jax: 0.10.0
libtpu: 0.0.40
codegen_flags: <defaults>
</compile_context>

<pallas_src>
import functools

import jax
import jax.numpy as jnp
from jax import lax
from jax.experimental import pallas as pl
from jax.experimental.pallas import tpu as pltpu


def _gcb_kernel(xq_ref, x_ref, wt_ref, wp_ref, wall_ref, o_ref, *,
                num_heads, channels):
    f32 = jnp.float32
    bf16 = jnp.bfloat16

    xq = xq_ref[...].astype(bf16)     # (TQ, C)   query row tile
    x = x_ref[...].astype(bf16)       # (N, C)    full token matrix (keys/values)
    wt = wt_ref[...]                  # (C, C)    W_theta^T, bf16
    wp = wp_ref[...]                  # (C, C)    W_phi^T,   bf16
    w_all = wall_ref[...]             # (C, H*C)  [W_0^T | ... | W_{H-1}^T], bf16

    # Projections: bf16 MXU operands, f32 accumulation.
    theta_q = jnp.dot(xq, wt, preferred_element_type=f32)          # (TQ, C)
    phi = jnp.dot(x, wp, preferred_element_type=f32)               # (N, C)

    # e = theta_q @ phi^T expressed as a contraction over the channel axis,
    # so no transpose of phi is materialized.
    e = lax.dot_general(theta_q.astype(bf16), phi.astype(bf16),
                        dimension_numbers=(((1,), (1,)), ((), ())),
                        preferred_element_type=f32)                # (TQ, N)

    # Numerically stable row softmax; stats in f32, normalization deferred
    # past the value matmul.
    e_max = jnp.max(e, axis=1, keepdims=True)                      # (TQ, 1)
    p = jnp.exp(e - e_max)                                         # (TQ, N)
    row_sum = jnp.sum(p, axis=1, keepdims=True)                    # (TQ, 1)

    # Fused head projections: one wide matmul instead of H narrow ones.
    xk_all = jnp.dot(x, w_all, preferred_element_type=f32)         # (N, H*C)
    pxk = jnp.dot(p.astype(bf16), xk_all.astype(bf16),
                  preferred_element_type=f32)                      # (TQ, H*C)

    # relu(A @ Xk) = relu(p @ Xk) / row_sum   (row_sum > 0, relu pos. homog.)
    acc = jnp.maximum(pxk[:, :channels], 0.0)                      # (TQ, C)
    for k in range(1, num_heads):   # static unroll, lane-aligned 128-wide slices
        acc = acc + jnp.maximum(pxk[:, k * channels:(k + 1) * channels], 0.0)

    inv = pl.reciprocal(row_sum, approx=True)                      # EUP slot
    o_ref[...] = (acc * inv).astype(o_ref.dtype)


def prepare_gcb_params(w_theta, w_phi, w_heads, dtype=jnp.bfloat16):
    """One-time weight prep (off the hot path): transpose to lane-dense
    (in, out) layout, concat head weights, cast to bf16 for the MXU.

    w_theta / w_phi: (C, C) PyTorch Linear layout (out, in).
    w_heads: (H, C, C) stacked PyTorch Linear weights.
    """
    C = w_theta.shape[0]
    H = w_heads.shape[0]
    w_theta_t = w_theta.T.astype(dtype)                                  # (C, C)
    w_phi_t = w_phi.T.astype(dtype)                                      # (C, C)
    # w_all[i, k*C + o] = w_heads[k, o, i]  ->  x @ w_all == [x W_0^T | ...]
    w_all = jnp.transpose(w_heads, (2, 0, 1)).reshape(C, H * C).astype(dtype)
    return w_theta_t, w_phi_t, w_all


def global_context_block(x, w_theta_t, w_phi_t, w_all, *, num_heads, tq=None):
    """Hot path: x (N, C) f32; prepared weights from prepare_gcb_params."""
    N, C = x.shape
    H = num_heads
    assert w_all.shape == (C, H * C)

    if tq is None:
        tq = N
    assert N % tq == 0, "query tile must divide N"
    assert tq == N or (tq % 8 == 0 and C % 128 == 0), "(8,128) tiling constraint"
    n_tiles = N // tq

    # Advisory cost for the XLA scheduler (phi / xk_all recomputed per tile).
    flops = (2 * N * C * C                      # theta (over all tiles)
             + n_tiles * 2 * N * C * C          # phi per tile
             + 2 * N * N * C                    # e
             + n_tiles * 2 * N * C * (H * C)    # xk_all per tile
             + 2 * N * N * (H * C))             # p @ xk_all
    bytes_accessed = (4 * N * C                               # query tiles (f32)
                      + n_tiles * 4 * N * C                   # full x per tile (f32)
                      + n_tiles * 2 * (2 * C * C + C * H * C) # bf16 weights per tile
                      + 4 * N * C)                            # output (f32)
    cost = pl.CostEstimate(flops=flops,
                           transcendentals=N * N + N,
                           bytes_accessed=bytes_accessed)

    kernel = functools.partial(_gcb_kernel, num_heads=H, channels=C)
    return pl.pallas_call(
        kernel,
        out_shape=jax.ShapeDtypeStruct((N, C), jnp.float32),
        grid=(n_tiles,),
        in_specs=[
            pl.BlockSpec((tq, C), lambda i: (i, 0)),      # query row tile of X
            pl.BlockSpec((N, C), lambda i: (0, 0)),       # full X (keys / values)
            pl.BlockSpec((C, C), lambda i: (0, 0)),       # W_theta^T (bf16)
            pl.BlockSpec((C, C), lambda i: (0, 0)),       # W_phi^T   (bf16)
            pl.BlockSpec((C, H * C), lambda i: (0, 0)),   # fused head weights (bf16)
        ],
        out_specs=pl.BlockSpec((tq, C), lambda i: (i, 0)),
        cost_estimate=cost,
        compiler_params=pltpu.CompilerParams(
            dimension_semantics=("parallel",)),
    )(x, x, w_theta_t, w_phi_t, w_all)


def _reference(x, w_theta, w_phi, w_heads):
    theta = x @ w_theta.T
    phi = x @ w_phi.T
    e = theta @ phi.T
    A = jax.nn.softmax(e, axis=1)
    out = jnp.zeros_like(x)
    for k in range(w_heads.shape[0]):
        xk = x @ w_heads[k].T
        out = out + jnp.maximum(A @ xk, 0.0)
    return out


if __name__ == "__main__":
    N, C, H = 64, 128, 3   # tokens, in_channels, num_heads
    TQ = 32                # query row tile -> grid of 2 "parallel" steps

    key = jax.random.PRNGKey(0)
    kx, kt, kp, kh = jax.random.split(key, 4)

    x = jax.random.normal(kx, (N, C), dtype=jnp.float32)
    # Synthetic params at ~PyTorch default Linear init scale (stddev ~ 1/sqrt(3C)).
    scale = 1.0 / jnp.sqrt(jnp.float32(3 * C))
    w_theta = jax.random.normal(kt, (C, C), dtype=jnp.float32) * scale
    w_phi = jax.random.normal(kp, (C, C), dtype=jnp.float32) * scale
    w_heads = jax.random.normal(kh, (H, C, C), dtype=jnp.float32) * scale

    # One-time weight prep (off the hot path).
    w_theta_t, w_phi_t, w_all = prepare_gcb_params(w_theta, w_phi, w_heads)

    out = global_context_block(x, w_theta_t, w_phi_t, w_all, num_heads=H, tq=TQ)
    out = jax.block_until_ready(out)

    ref = _reference(x, w_theta, w_phi, w_heads)
    assert out.shape == (N, C)
    # Tolerance covers bf16 MXU operands (f32 accumulation) vs. the f32 reference.
    assert bool(jnp.allclose(out, ref, atol=5e-2, rtol=5e-2)), "mismatch vs reference"

    print("KERNEL_OK")
</pallas_src>

<mosaic_0001>
module attributes {stable_mosaic.version = 11 : i64} {
  func.func @_gcb_kernel(%arg0: i32, %arg1: memref<32x128xf32, #tpu.memory_space<vmem>>, %arg2: memref<64x128xf32, #tpu.memory_space<vmem>>, %arg3: memref<128x128xbf16, #tpu.memory_space<vmem>>, %arg4: memref<128x128xbf16, #tpu.memory_space<vmem>>, %arg5: memref<128x384xbf16, #tpu.memory_space<vmem>>, %arg6: memref<32x128xf32, #tpu.memory_space<vmem>>) attributes {dimension_semantics = [#tpu.dimension_semantics<parallel>], iteration_bounds = array<i64: 2>, scalar_prefetch = 0 : i64, scratch_operands = 0 : i64, tpu.core_type = #tpu.core_type<tc>, window_params = [{transform_indices = @transform_0, window_bounds = array<i64: 32, 128>}, {pipeline_mode = #tpu.pipeline_mode<synchronous>, transform_indices = @transform_1, window_bounds = array<i64: 64, 128>}, {pipeline_mode = #tpu.pipeline_mode<synchronous>, transform_indices = @transform_2, window_bounds = array<i64: 128, 128>}, {pipeline_mode = #tpu.pipeline_mode<synchronous>, transform_indices = @transform_3, window_bounds = array<i64: 128, 128>}, {pipeline_mode = #tpu.pipeline_mode<synchronous>, transform_indices = @transform_4, window_bounds = array<i64: 128, 384>}, {transform_indices = @transform_5, window_bounds = array<i64: 32, 128>}]} {
    %c0 = arith.constant 0 : index
    %c0_0 = arith.constant 0 : index
    %0 = vector.load %arg1[%c0, %c0_0] : memref<32x128xf32, #tpu.memory_space<vmem>>, vector<32x128xf32>
    %1 = arith.truncf %0 : vector<32x128xf32> to vector<32x128xbf16>
    %c0_1 = arith.constant 0 : index
    %c0_2 = arith.constant 0 : index
    %2 = vector.load %arg2[%c0_1, %c0_2] : memref<64x128xf32, #tpu.memory_space<vmem>>, vector<64x128xf32>
    %3 = arith.truncf %2 : vector<64x128xf32> to vector<64x128xbf16>
    %c0_3 = arith.constant 0 : index
    %c0_4 = arith.constant 0 : index
    %4 = vector.load %arg3[%c0_3, %c0_4] : memref<128x128xbf16, #tpu.memory_space<vmem>>, vector<128x128xbf16>
    %c0_5 = arith.constant 0 : index
    %c0_6 = arith.constant 0 : index
    %5 = vector.load %arg4[%c0_5, %c0_6] : memref<128x128xbf16, #tpu.memory_space<vmem>>, vector<128x128xbf16>
    %c0_7 = arith.constant 0 : index
    %c0_8 = arith.constant 0 : index
    %6 = vector.load %arg5[%c0_7, %c0_8] : memref<128x384xbf16, #tpu.memory_space<vmem>>, vector<128x384xbf16>
    %cst = arith.constant dense<0.000000e+00> : vector<32x128xf32>
    %7 = tpu.matmul %1, %4, %cst {dimension_numbers = #tpu.dot_dimension_numbers<[1], [0], [0], [1], [0, 0, 1, 1], [], []>} : vector<32x128xbf16>, vector<128x128xbf16>, vector<32x128xf32> -> vector<32x128xf32>
    %cst_9 = arith.constant dense<0.000000e+00> : vector<64x128xf32>
    %8 = tpu.matmul %3, %5, %cst_9 {dimension_numbers = #tpu.dot_dimension_numbers<[1], [0], [0], [1], [0, 0, 1, 1], [], []>} : vector<64x128xbf16>, vector<128x128xbf16>, vector<64x128xf32> -> vector<64x128xf32>
    %9 = arith.truncf %7 : vector<32x128xf32> to vector<32x128xbf16>
    %10 = arith.truncf %8 : vector<64x128xf32> to vector<64x128xbf16>
    %cst_10 = arith.constant dense<0.000000e+00> : vector<32x64xf32>
    %11 = tpu.matmul %9, %10, %cst_10 {dimension_numbers = #tpu.dot_dimension_numbers<[1], [1], [0], [0], [0, 0, 1, 0], [], []>} : vector<32x128xbf16>, vector<64x128xbf16>, vector<32x64xf32> -> vector<32x64xf32>
    %cst_11 = arith.constant dense<0xFF800000> : vector<32xf32>
    %12 = vector.multi_reduction <maximumf>, %11, %cst_11 [1] : vector<32x64xf32> to vector<32xf32>
    %13 = vector.shape_cast %12 : vector<32xf32> to vector<32x1xf32>
    %14 = vector.broadcast %13 : vector<32x1xf32> to vector<32x64xf32>
    %15 = arith.subf %11, %14 : vector<32x64xf32>
    %16 = math.exp %15 : vector<32x64xf32>
    %cst_12 = arith.constant dense<0.000000e+00> : vector<32xf32>
    %17 = vector.multi_reduction <add>, %16, %cst_12 [1] : vector<32x64xf32> to vector<32xf32>
    %18 = vector.shape_cast %17 : vector<32xf32> to vector<32x1xf32>
    %cst_13 = arith.constant dense<0.000000e+00> : vector<64x384xf32>
    %19 = tpu.matmul %3, %6, %cst_13 {dimension_numbers = #tpu.dot_dimension_numbers<[1], [0], [0], [1], [0, 0, 1, 1], [], []>} : vector<64x128xbf16>, vector<128x384xbf16>, vector<64x384xf32> -> vector<64x384xf32>
    %20 = arith.truncf %16 : vector<32x64xf32> to vector<32x64xbf16>
    %21 = arith.truncf %19 : vector<64x384xf32> to vector<64x384xbf16>
    %cst_14 = arith.constant dense<0.000000e+00> : vector<32x384xf32>
    %22 = tpu.matmul %20, %21, %cst_14 {dimension_numbers = #tpu.dot_dimension_numbers<[1], [0], [0], [1], [0, 0, 1, 1], [], []>} : vector<32x64xbf16>, vector<64x384xbf16>, vector<32x384xf32> -> vector<32x384xf32>
    %23 = vector.extract_strided_slice %22 {offsets = [0, 0], sizes = [32, 128], strides = [1, 1]} : vector<32x384xf32> to vector<32x128xf32>
    %cst_15 = arith.constant 0.000000e+00 : f32
    %24 = vector.broadcast %cst_15 : f32 to vector<32x128xf32>
    %25 = arith.maximumf %23, %24 : vector<32x128xf32>
    %26 = vector.extract_strided_slice %22 {offsets = [0, 128], sizes = [32, 128], strides = [1, 1]} : vector<32x384xf32> to vector<32x128xf32>
    %cst_16 = arith.constant 0.000000e+00 : f32
    %27 = vector.broadcast %cst_16 : f32 to vector<32x128xf32>
    %28 = arith.maximumf %26, %27 : vector<32x128xf32>
    %29 = arith.addf %25, %28 : vector<32x128xf32>
    %30 = vector.extract_strided_slice %22 {offsets = [0, 256], sizes = [32, 128], strides = [1, 1]} : vector<32x384xf32> to vector<32x128xf32>
    %cst_17 = arith.constant 0.000000e+00 : f32
    %31 = vector.broadcast %cst_17 : f32 to vector<32x128xf32>
    %32 = arith.maximumf %30, %31 : vector<32x128xf32>
    %33 = arith.addf %29, %32 : vector<32x128xf32>
    %34 = tpu.reciprocal %18 {approx = true} : vector<32x1xf32> -> vector<32x1xf32>
    %35 = vector.broadcast %34 : vector<32x1xf32> to vector<32x128xf32>
    %36 = arith.mulf %33, %35 : vector<32x128xf32>
    %c0_18 = arith.constant 0 : index
    %c0_19 = arith.constant 0 : index
    %37 = vector.load %arg6[%c0_18, %c0_19] : memref<32x128xf32, #tpu.memory_space<vmem>>, vector<32x128xf32>
    tpu.vector_store %arg6[%c0_18, %c0_19], %36 {strides = array<i32>} : memref<32x128xf32, #tpu.memory_space<vmem>>, vector<32x128xf32>,
    return
  }
  func.func @transform_0(%arg0: i32) -> (i32, i32) {
    %c0_i32 = arith.constant 0 : i32
    %c0_i32_0 = arith.constant 0 : i32
    return %arg0, %c0_i32 : i32, i32
  }
  func.func @transform_1(%arg0: i32) -> (i32, i32) {
    %c0_i32 = arith.constant 0 : i32
    %c0_i32_0 = arith.constant 0 : i32
    %c0_i32_1 = arith.constant 0 : i32
    return %c0_i32, %c0_i32_0 : i32, i32
  }
  func.func @transform_2(%arg0: i32) -> (i32, i32) {
    %c0_i32 = arith.constant 0 : i32
    %c0_i32_0 = arith.constant 0 : i32
    %c0_i32_1 = arith.constant 0 : i32
    return %c0_i32, %c0_i32_0 : i32, i32
  }
  func.func @transform_3(%arg0: i32) -> (i32, i32) {
    %c0_i32 = arith.constant 0 : i32
    %c0_i32_0 = arith.constant 0 : i32
    %c0_i32_1 = arith.constant 0 : i32
    return %c0_i32, %c0_i32_0 : i32, i32
  }
  func.func @transform_4(%arg0: i32) -> (i32, i32) {
    %c0_i32 = arith.constant 0 : i32
    %c0_i32_0 = arith.constant 0 : i32
    %c0_i32_1 = arith.constant 0 : i32
    return %c0_i32, %c0_i32_0 : i32, i32
  }
  func.func @transform_5(%arg0: i32) -> (i32, i32) {
    %c0_i32 = arith.constant 0 : i32
    %c0_i32_0 = arith.constant 0 : i32
    return %arg0, %c0_i32 : i32, i32
  }
}

</mosaic_0001>

<bundles_post_ra>
// kernel: tpu_custom_call.1
= control target key start
LH: loop header
LB: loop body
LE: loop exit
PB: predicated region body
PF: predicated region fallthrough
CT: control target
= control target key end

     0   :  { %10 = vsyncpa [#allocation3], 0  ;;  %s2112_s0 = inlined_call_operand.hbm [shape: f32[64,128], index: 0, kind: input, shape index: {}]   ;;  %s2113_s1 = inlined_call_operand.hbm [shape: f32[64,128], index: 1, kind: input, shape index: {}]   ;;  %s2114_s2 = inlined_call_operand.hbm [shape: bf16[128,128], index: 2, kind: input, shape index: {}]   ;;  %s2115_s3 = inlined_call_operand.hbm [shape: bf16[128,128], index: 3, kind: input, shape index: {}]   ;;  %s2116_s4 = inlined_call_operand.hbm [shape: bf16[128,384], index: 4, kind: input, shape index: {}]   ;;  %s2117_s5 = inlined_call_operand.hbm [shape: f32[64,128], index: 5, kind: output, shape index: {}]  }
   0x1   :  { %12 = vsyncpa [#allocation3 + $0x1], 0 }
   0x2   :  { %13 = vsyncpa [#allocation6], 0 }
   0x3   :  { %14 = vsyncpa [#allocation9], 0 }
   0x4   :  { %15 = vsyncpa [#allocation4], 0 }
   0x5   :  { %17 = vsyncpa [#allocation4 + $0x1], 0  ;;  %s1850_s18 = smov 0   ;;  %s1852_s19 = smov 0  }
   0x6   :  { %s1854_s20 = smov 0   ;;  %s1856_s21 = smov 0  }
   0x7 LB: > { %s1871_s22 = sadd.s32 4294967295, %s1803_s21   ;;  %s1233_s23 = sadd.s32 4294967294, %s1803_s21   ;;  %s1803_s21 = sphi %s1856_s21, %s2143_s21   ;;  %s1799_s20 = sphi %s1854_s20, %s2142_s20   ;;  %s1795_s19 = sphi %s1852_s19, %s2141_s19   ;;  %s1791_s18 = sphi %s1850_s18, %s2140_s18  }
   0x8   : > { %p43_p0 = scmp.ne.s32.totalorder %s1795_s19, %s1791_s18  ;;  %p2118_p1 = scmp.eq.s32.totalorder %s1871_s22, 0 }
   0x9   : > { %p157_p3 = scmp.eq.s32.totalorder %s1233_s23, 1  ;;  %p1234_p5 = scmp.ge.s32.totalorder %s1803_s21, 1 }
   0xa   : > { %p1880_p4 = por %p2118_p1, %p43_p0  ;;  %p164_p7 = scmp.lt.s32.totalorder %s1803_s21, 3 }
   0xb   : > { %p1885_p6 = por %p157_p3, %p43_p0  ;;  %s1805_s27 = smov [#allocation5]  }
   0xc   : > { %s2123_s24 = scalar_select %p1880_p4, 1, 0 }
   0xd   : > { %s2124_s25 = scalar_select %p1885_p6, 1, 0 }
   0xe   : > { %p1890_p8 = pnand %p1234_p5, %p164_p7  ;;  %s176_s28 = sshll.u32 %s1805_s27, 4  ;;  %s177_s28 = int_to_ptr.vmem [resolvable:$true] %s176_s28 }
   0xf   : > { %s1806_s30 = smov [#allocation8]   ;;  %s1610_s7 = scalar_lea.vmem %s177_s28, 1024 }
  0x10   : > { %s2125_s26 = scalar_select %p1890_p8, 1, 0 }
  0x11   : > { %p1459_p9 = pneg %p1890_p8  ;;  %s202_s6 = sshll.u32 %s1806_s30, 4  ;;  %s203_s6 = int_to_ptr.vmem [resolvable:$true] %s202_s6 }
  0x12   : > { %p1611_p13 = scmp.ne.s32.totalorder %s177_s28, %s1610_s7  ;;  %p1618_p5 = scmp.lt.s32.totalorder %s177_s28, %s177_s28 }
  0x13   : > { %p1899_p11 = pnand %p1459_p9, %p2118_p1  ;;  %p1619_p7 = scmp.lt.s32.totalorder %s1610_s7, %s1610_s7 }
  0x15   : > { %p1601_p12 = pneg %p1899_p11  ;;  %p1620_p10 = por %p1619_p7, %p1618_p5 }
  0x17   : > { %p1613_p0 = pnand %p1611_p13, %p1601_p12 }
  0x19   : > { %p1614_p3 = pneg %p1613_p0 }
  0x1b   : > { %p1621_p2 = pnand %p1620_p10, %p1614_p3 }
  0x1d   : > { %1624 = shalt.err (!%p1621_p2)
}
  0x1e   : > { %s2119_s8 = smov 128   ;;  %s1808_s9 = smov 8  }
  0x1f   : > { %1462 = dma.hbm_to_vmem [thread:$0]  (!%p1899_p11), %s2113_s1, 1024, %s177_s28, [#allocation6], %s2119_s8, %s2119_s8, %s1808_s9  }
  0x20   : > { %s1809_s12 = smov [#allocation7]   ;;  %s1636_s14 = scalar_lea.vmem %s203_s6, 1024 }
  0x21   : > { %s189_s13 = sshll.u32 %s1809_s12, 4  ;;  %p1637_p9 = scmp.ne.s32.totalorder %s203_s6, %s1636_s14  ;;  %s190_s13 = int_to_ptr.vmem [resolvable:$true] %s189_s13 }
  0x22   : > { %p1644_p13 = scmp.lt.s32.totalorder %s203_s6, %s203_s6  ;;  %p1645_p0 = scmp.lt.s32.totalorder %s1636_s14, %s1636_s14 }
  0x23   : > { %p1639_p2 = pnand %p1637_p9, %p1601_p12 }
  0x24   : > { %p1646_p3 = por %p1645_p0, %p1644_p13 }
  0x25   : > { %p1640_p10 = pneg %p1639_p2 }
  0x27   : > { %p1647_p5 = pnand %p1646_p3, %p1640_p10 }
  0x29   : > { %1650 = shalt.err (!%p1647_p5)
}
  0x2a   : > { %s1810_s15 = smov 64   ;;  %s1811_s16 = smov 4  }
  0x2b   : > { %1468 = dma.hbm_to_vmem [thread:$0]  (!%p1899_p11), %s2115_s3, 1024, %s203_s6, [#allocation9], %s1810_s15, %s1810_s15, %s1811_s16  }
  0x2c   : > { %s1662_s27 = scalar_lea.vmem %s190_s13, 1024  ;;  %p1670_p1 = scmp.lt.s32.totalorder %s190_s13, %s190_s13 }
  0x2d   : > { %p1663_p7 = scmp.ne.s32.totalorder %s190_s13, %s1662_s27  ;;  %p1671_p13 = scmp.lt.s32.totalorder %s1662_s27, %s1662_s27 }
  0x2f   : > { %p1665_p9 = pnand %p1663_p7, %p1601_p12  ;;  %p1672_p10 = por %p1671_p13, %p1670_p1 }
  0x31   : > { %p1666_p2 = pneg %p1665_p9 }
  0x33   : > { %p1673_p0 = pnand %p1672_p10, %p1666_p2 }
  0x35   : > { %1676 = shalt.err (!%p1673_p0)
}
  0x36   : > { %1465 = dma.hbm_to_vmem [thread:$0]  (!%p1899_p11), %s2114_s2, 1024, %s190_s13, [#allocation6], %s1810_s15, %s1810_s15, %s1811_s16  }
  0x37   : > { %s1812_s6 = smov [#allocation10]  }
  0x38   : > { %s215_s7 = sshll.u32 %s1812_s6, 4  ;;  %s216_s7 = int_to_ptr.vmem [resolvable:$true] %s215_s7 }
  0x39   : > { %s1688_s10 = scalar_lea.vmem %s216_s7, 3072  ;;  %p1696_p9 = scmp.lt.s32.totalorder %s216_s7, %s216_s7 }
  0x3a   : > { %p1689_p3 = scmp.ne.s32.totalorder %s216_s7, %s1688_s10  ;;  %p1697_p1 = scmp.lt.s32.totalorder %s1688_s10, %s1688_s10 }
  0x3c   : > { %p1691_p5 = pnand %p1689_p3, %p1601_p12  ;;  %p1698_p2 = por %p1697_p1, %p1696_p9 }
  0x3e   : > { %p1692_p7 = pneg %p1691_p5 }
  0x40   : > { %p1699_p13 = pnand %p1698_p2, %p1692_p7 }
  0x42   : > { %1702 = shalt.err (!%p1699_p13)
}
  0x43   : > { %s1813_s11 = smov 192   ;;  %s1814_s12 = smov 12  }
  0x44   : > { %1471 = dma.hbm_to_vmem [thread:$0]  (!%p1899_p11), %s2116_s4, 3072, %s216_s7, [#allocation9], %s1813_s11, %s1813_s11, %s1814_s12  }
  0x45   : > { %s1941_s15 = sadd.s32 1, %s1803_s21   ;;  %s30_s17 = sadd.s32 1, %s1799_s20 }
  0x46   : > { %s27_s16 = ssub.s32 %s1803_s21, %s1941_s15  ;;  %p37_p10 = scmp.ne.s32.totalorder %s1799_s20, %s1795_s19 }
  0x47   : > { %p28_p12 = scmp.eq.s32.totalorder %s27_s16, 0  ;;  %p38_p0 = scmp.eq.s32.totalorder %s1803_s21, 0 }
  0x48   : > { %p2127_p5 = scmp.eq.s32.totalorder %s1871_s22, 1  ;;  %p1484_p9 = scmp.lt.s32.totalorder %s1803_s21, 2 }
  0x49   : > { %s1950_s23 = scalar_select %p28_p12, %s1799_s20, %s30_s17  }
  0x4a   : > { %p39_p3 = por %p38_p0, %p37_p10  ;;  %p1954_p7 = por %p2127_p5, %p37_p10 }
  0x4b   : > { %s229_s29 = sand.u32 1, %s1799_s20   ;;  %s1299_s30 = sshll.u32 %s1803_s21, 9 }
  0x4c   : > { %s2128_s27 = scalar_select %p1954_p7, 1, 0 }
  0x4d   : > { %s1240_s28 = sshll.u32 %s229_s29, 5  ;;  %s1964_s10 = scalar_lea.hbm %s2112_s0, %s1299_s30 }
  0x4e   : > { %s233_s11 = scalar_lea.vmem [#allocation2], %s1240_s28  ;;  %p1968_p11 = pnand %p1484_p9, %p39_p3 }
  0x4f   : > { %s240_s12 = sshll.u32 %s233_s11, 4  ;;  %s1972_s14 = scalar_lea.sflag [#allocation3], %s229_s29  ;;  %s1966_s12 = int_to_ptr.vmem [resolvable:$true] %s240_s12 }
  0x50   : > { %s1703_s16 = scalar_lea.hbm %s1964_s10, 512  ;;  %p1705_p2 = pneg %p1968_p11 }
  0x51   : > { %p1704_p1 = scmp.ne.s32.totalorder %s1964_s10, %s1703_s16  ;;  %s1708_s28 = scalar_lea.hbm %s2112_s0, 1024 }
  0x52   : > { %p1709_p10 = scmp.lt.s32.totalorder %s1964_s10, %s2112_s0  ;;  %p1710_p0 = scmp.lt.s32.totalorder %s1708_s28, %s1703_s16 }
  0x53   : > { %p1706_p13 = pnand %p1705_p2, %p1704_p1 }
  0x54   : > { %p1711_p3 = por %p1710_p0, %p1709_p10 }
  0x55   : > { %p1707_p12 = pneg %p1706_p13 }
  0x57   : > { %p1712_p5 = pnand %p1711_p3, %p1707_p12 }
  0x59   : > { %1715 = shalt.err (!%p1712_p5)
}
  0x5a   : > { %s1716_s29 = scalar_lea.vmem %s1966_s12, 512  ;;  %s1815_s11 = smov [#allocation2]  }
  0x5b   : > { %p1717_p9 = scmp.ne.s32.totalorder %s1966_s12, %s1716_s29  ;;  %s1721_s8 = sshll.u32 %s1815_s11, 4  ;;  %s1722_s8 = int_to_ptr.vmem [resolvable:$false] %s1721_s8 }
  0x5c   : > { %s1723_s17 = scalar_lea.vmem %s1722_s8, 1024  ;;  %p1724_p13 = scmp.lt.s32.totalorder %s1966_s12, %s1722_s8 }
  0x5d   : > { %p1719_p6 = pnand %p1717_p9, %p1705_p2  ;;  %p1725_p7 = scmp.lt.s32.totalorder %s1723_s17, %s1716_s29 }
  0x5f   : > { %p1720_p1 = pneg %p1719_p6  ;;  %p1726_p4 = por %p1725_p7, %p1724_p13 }
  0x61   : > { %p1727_p8 = pnand %p1726_p4, %p1720_p1 }
  0x63   : > { %1730 = shalt.err (!%p1727_p8)
}
  0x64   : > { %s2130_s16 = smov 128   ;;  %p2131_p6 = scmp.ne.s32.totalorder %s2125_s26, 0 }
  0x65   : > { %1475 = dma.hbm_to_vmem [thread:$0]  (!%p1968_p11), %s1964_s10, 512, %s1966_s12, %s1972_s14, %s2130_s16, %s2130_s16, %s1808_s9  }
  0x66   : > { %252 = sbr.rel (%p2131_p6) target bundleno = 974 (0x3ce), region = 40  ;;  %s1999_s30 = sand.u32 (!%p2131_p6), 1, %s1795_s19  }
  0x67   : > { %s1244_s8 = sshll.u32 (!%p2131_p6), %s1999_s30, 5  ;;  %s255_s28 = scalar_lea.sflag (!%p2131_p6), [#allocation3], %s1999_s30 }
  0x68   : > { %s2005_s13 = scalar_lea.vmem (!%p2131_p6), [#allocation2], %s1244_s8  ;;  %p2132_p4 = scmp.ne.s32.totalorder (!%p2131_p6), %s2123_s24, 0 }
  0x6b   : > { %1774 = dma.done.wait (%p2132_p4), %s255_s28, 512  }
  0x6c   : > { %1776 = vsyncadd (%p2132_p4), %s255_s28, 4294966784  ;;  %p2133_p8 = scmp.eq.s32.totalorder %s1871_s22, 0 }
  0x6e   : > { %1778 = dma.done.wait (%p2133_p8), [#allocation6], 2048   ;;  %p2134_p7 = pmov %p2133_p8 }
  0x70   : > { %1780 = vsyncadd (%p2134_p7), [#allocation6], 4294965248  ;;  %p2135_p11 = pmov %p2134_p7 }
  0x71   : > { %p2136_p2 = pmov %p2134_p7 }
  0x72   : > { %1782 = dma.done.wait (%p2135_p11), [#allocation9], 4096  }
  0x73   : > { %1784 = vsyncadd (%p2136_p2), [#allocation9], 4294963200  ;;  %v1535_v0 = vld [vmem:[#allocation8 + $0x38] sm:$0xff]   ;;  %v1536_v1 = vld [vmem:[#allocation8 + $0x30] sm:$0xff]   ;;  %v1816_v39 = vmov 0   ;;  %vm651_vm0 = vcmask 523264  }
  0x74   : > { %1367 = vmatprep.subr.bf16.mxu1 %v1535_v0  ;;  %v1537_v2 = vld [vmem:[#allocation8 + $0x28] sm:$0xff]   ;;  %v1538_v3 = vld [vmem:[#allocation8 + $0x20] sm:$0xff]   ;;  %v1543_v4 = vld [vmem:[#allocation7 + $0x38] sm:$0xff]   ;;  %s300_s24 = scalar_lea.vmem [#allocation11], %s1244_s8  ;;  %s1300_s9 = sshll.u32 %s1871_s22, 9 }
  0x75   : > { %1368 = vmatpush3.bf16.msra.mxu1 %v1535_v0  ;;  %v310_v5 = vld [vmem:[#allocation5] sm:$0xff]  ;;  %v311_v6 = vld [vmem:[#allocation5 + $0x8] sm:$0xff]  ;;  %1347 = vmatprep.subr.bf16.mxu0 %v1543_v4  ;;  %v1544_v8 = vld [vmem:[#allocation7 + $0x30] sm:$0xff]   ;;  %s1122_s26 = sshll.u32 %s300_s24, 4  ;;  %s2069_s14 = scalar_lea.hbm %s2117_s5, %s1300_s9  ;;  %s2064_s26 = int_to_ptr.vmem [resolvable:$true] %s1122_s26 }
  0x76   : > { %1369 = vmatprep.subr.bf16.mxu1 %v1536_v1  ;;  %v2019_v7 = vpack.c.bf16 %v311_v6, %v310_v5  ;;  %1348 = vmatpush3.bf16.msra.mxu0 %v1543_v4  ;;  %v1539_v9 = vld [vmem:[#allocation8 + $0x18] sm:$0xff]   ;;  %v1545_v10 = vld [vmem:[#allocation7 + $0x28] sm:$0xff]   ;;  %v1540_v11 = vld [vmem:[#allocation8 + $0x10] sm:$0xff]   ;;  %s1109_s6 = scalar_lea.sflag [#allocation4], %s1999_s30  ;;  %s1731_s7 = scalar_lea.vmem %s2064_s26, 512 }
  0x77   : > { %1349 = vmatprep.subr.bf16.mxu0 %v1544_v8  ;;  %v1546_v12 = vld [vmem:[#allocation7 + $0x20] sm:$0xff]   ;;  %v1541_v14 = vld [vmem:[#allocation8 + $0x8] sm:$0xff]   ;;  %v1547_v15 = vld [vmem:[#allocation7 + $0x18] sm:$0xff]   ;;  %p1732_p12 = scmp.ne.s32.totalorder %s2064_s26, %s1731_s7  ;;  %p2137_p10 = scmp.ne.s32.totalorder %s2128_s27, 0 }
  0x78   : > { %1383 = vmatprep.mubr.bf16.mxu1 %v2019_v7  ;;  %v304_v13 = vld [vmem:[%s2005_s13] sm:$0xff]  ;;  %v305_v16 = vld [vmem:[%s2005_s13 + $0x8] sm:$0xff]  ;;  %v1548_v19 = vld [vmem:[#allocation7 + $0x10] sm:$0xff]   ;;  %s1817_s22 = smov [#allocation11]  }
  0x79   : > { %1370 = vmatpush3.bf16.msra.mxu1 %v1536_v1  ;;  %v308_v17 = vpack.c.bf16 %v305_v16, %v304_v13  ;;  %v1542_v18 = vld [vmem:[#allocation8] sm:$0xff]   ;;  %v312_v20 = vld [vmem:[#allocation5 + $0x10] sm:$0xff]  ;;  %v313_v21 = vld [vmem:[#allocation5 + $0x18] sm:$0xff]  ;;  %p1733_p0 = pnand %p1732_p12, %p2137_p10  ;;  %s1735_s29 = sshll.u32 %s1817_s22, 4  ;;  %s1736_s29 = int_to_ptr.vmem [resolvable:$false] %s1735_s29 }
  0x7a   : > { %1371 = vmatprep.subr.bf16.mxu1 %v1537_v2  ;;  %1350 = vmatpush3.bf16.msra.mxu0 %v1544_v8  ;;  %v314_v22 = vld [vmem:[#allocation5 + $0x20] sm:$0xff]  ;;  %v315_v23 = vld [vmem:[#allocation5 + $0x28] sm:$0xff]  ;;  %v2024_v25 = vpack.c.bf16 %v313_v21, %v312_v20  ;;  %v316_v28 = vld [vmem:[#allocation5 + $0x30] sm:$0xff]  ;;  %s1737_s11 = scalar_lea.vmem %s1736_s29, 1024  ;;  %p1738_p5 = scmp.lt.s32.totalorder %s2064_s26, %s1736_s29 }
  0x7b   : > { %1351 = vmatprep.subr.bf16.mxu0 %v1545_v10  ;;  %1363 = vmatprep.mubr.bf16.mxu0 %v308_v17  ;;  %v1549_v24 = vld [vmem:[#allocation7 + $0x8] sm:$0xff]   ;;  %v2026_v26 = vpack.c.bf16 %v315_v23, %v314_v22  ;;  %v1550_v27 = vld [vmem:[#allocation7] sm:$0xff]   ;;  %v317_v29 = vld [vmem:[#allocation5 + $0x38] sm:$0xff]  ;;  %p1734_p3 = pneg %p1733_p0  ;;  %p1739_p9 = scmp.lt.s32.totalorder %s1737_s11, %s1731_s7 }
  0x7c   : > { %v306_v30 = vld [vmem:[%s2005_s13 + $0x10] sm:$0xff]  ;;  %v307_v31 = vld [vmem:[%s2005_s13 + $0x18] sm:$0xff]  ;;  %v2032_v32 = vpack.c.bf16 %v317_v29, %v316_v28  ;;  %v1560_v42 = vld [vmem:[#allocation10 + $0x60] ss:$12 sps:$4 sm:$0xff]  }
  0x7d   : > { %1372 = vmatpush3.bf16.msra.mxu1 %v1537_v2  ;;  %v309_v33 = vpack.c.bf16 %v307_v31, %v306_v30  ;;  %v1551_v34 = vld [vmem:[#allocation10 + $0xa8] ss:$12 sps:$4 sm:$0xff]   ;;  %v1553_v35 = vld [vmem:[#allocation10 + $0xac] ss:$12 sps:$4 sm:$0xff]   ;;  %v1554_v37 = vld [vmem:[#allocation10 + $0x90] ss:$12 sps:$4 sm:$0xff]   ;;  %p1740_p1 = por %p1739_p9, %p1738_p5 }
  0x7e   : > { %1373 = vmatprep.subr.bf16.mxu1 %v1538_v3  ;;  %1352 = vmatpush3.bf16.msra.mxu0 %v1545_v10  ;;  %v1556_v36 = vld [vmem:[#allocation10 + $0x94] ss:$12 sps:$4 sm:$0xff]   ;;  %v1559_v38 = vld [vmem:[#allocation10 + $0x7c] ss:$12 sps:$4 sm:$0xff]   ;;  %v1557_v40 = vld [vmem:[#allocation10 + $0x78] ss:$12 sps:$4 sm:$0xff]  }
  0x7f   : > { %1353 = vmatprep.subr.bf16.mxu0 %v1546_v12  ;;  %v1562_v41 = vld [vmem:[#allocation10 + $0x64] ss:$12 sps:$4 sm:$0xff]   ;;  %v1565_v43 = vld [vmem:[#allocation10 + $0x4c] ss:$12 sps:$4 sm:$0xff]   ;;  %v1563_v44 = vld [vmem:[#allocation10 + $0x48] ss:$12 sps:$4 sm:$0xff]   ;;  %p1741_p13 = pnand %p1740_p1, %p1734_p3 }
  0x80   : > { %v1568_v45 = vld [vmem:[#allocation10 + $0x34] ss:$12 sps:$4 sm:$0xff]   ;;  %v1566_v46 = vld [vmem:[#allocation10 + $0x30] ss:$12 sps:$4 sm:$0xff]   ;;  %v1569_v48 = vld [vmem:[#allocation10 + $0x18] ss:$12 sps:$4 sm:$0xff]  }
  0x81   : > { %1374 = vmatpush3.bf16.msra.mxu1 %v1538_v3  ;;  %v1571_v47 = vld [vmem:[#allocation10 + $0x1c] ss:$12 sps:$4 sm:$0xff]   ;;  %v1574_v49 = vld [vmem:[#allocation10 + $0x4] ss:$12 sps:$4 sm:$0xff]   ;;  %v1572_v50 = vld [vmem:[#allocation10] ss:$12 sps:$4 sm:$0xff]  }
  0x82   : > { %1375 = vmatprep.subr.bf16.mxu1 %v1539_v9  ;;  %1354 = vmatpush3.bf16.msra.mxu0 %v1546_v12  ;;  %v1575_v4 = vld [vmem:[#allocation10 + $0xb0] ss:$12 sps:$4 sm:$0xff]   ;;  %v1576_v6 = vld [vmem:[#allocation10 + $0x98] ss:$12 sps:$4 sm:$0xff]   ;;  %v1577_v8 = vld [vmem:[#allocation10 + $0x80] ss:$12 sps:$4 sm:$0xff]  }
  0x83   : > { %1355 = vmatprep.subr.bf16.mxu0 %v1547_v15  ;;  %v1579_v10 = vld [vmem:[#allocation10 + $0x50] ss:$12 sps:$4 sm:$0xff]   ;;  %v1581_v12 = vld [vmem:[#allocation10 + $0x20] ss:$12 sps:$4 sm:$0xff]   ;;  %v1582_v13 = vld [vmem:[#allocation10 + $0x8] ss:$12 sps:$4 sm:$0xff]  }
  0x85   : > { %1376 = vmatpush3.bf16.msra.mxu1 %v1539_v9  ;;  %v1578_v9 = vld [vmem:[#allocation10 + $0x68] ss:$12 sps:$4 sm:$0xff]  }
  0x86   : > { %1377 = vmatprep.subr.bf16.mxu1 %v1540_v11  ;;  %1356 = vmatpush3.bf16.msra.mxu0 %v1547_v15 }
  0x87   : > { %1357 = vmatprep.subr.bf16.mxu0 %v1548_v19 }
  0x89   : > { %1378 = vmatpush3.bf16.msra.mxu1 %v1540_v11  ;;  %v1580_v11 = vld [vmem:[#allocation10 + $0x38] ss:$12 sps:$4 sm:$0xff]  }
  0x8a   : > { %1379 = vmatprep.subr.bf16.mxu1 %v1541_v14  ;;  %1358 = vmatpush3.bf16.msra.mxu0 %v1548_v19 }
  0x8b   : > { %1359 = vmatprep.subr.bf16.mxu0 %v1549_v24 }
  0x8d   : > { %1380 = vmatpush3.bf16.msra.mxu1 %v1541_v14 }
  0x8e   : > { %1381 = vmatprep.subr.bf16.mxu1 %v1542_v18  ;;  %1360 = vmatpush3.bf16.msra.mxu0 %v1549_v24 }
  0x8f   : > { %1361 = vmatprep.subr.bf16.mxu0 %v1550_v27 }
  0x91   : > { %1382 = vmatpush3.bf16.msra.mxu1 %v1542_v18 }
  0x92   : > { %1362 = vmatpush3.bf16.msra.mxu0 %v1550_v27  ;;  %816 = vmatprep.subr.bf16.mxu1 %v1553_v35 }
  0x94   : > { %1384 = vmatmul.mubr.bf16.vlgmr.msra.gmra.mxu1 %v2024_v25 }
  0x95   : > { %1387 = vmatprep.mubr.bf16.mxu1 %v2026_v26  ;;  %1364 = vmatmul.mubr.bf16.vlgmr.msra.gmra.mxu0 %v309_v33 }
  0x96   : > { %817 = vmatpush1.bf16.msra.mxu1 %v1551_v34 }
  0x97   : > { %818 = vmatprep.subr.bf16.mxu1 %v1556_v36 }
  0x9a   : > { %819 = vmatpush1.bf16.msra.mxu1 %v1554_v37 }
  0x9b   : > { %820 = vmatprep.subr.bf16.mxu1 %v1559_v38 }
  0x9c   : > { %1388 = vmatmul.mubr.bf16.gmra.mxu1 %v2032_v32 }
  0x9d   : > { %848 = vmatprep.mubr.bf16.mxu1 %v1816_v39 }
  0x9e   : > { %821 = vmatpush1.bf16.msra.mxu1 %v1557_v40 }
  0x9f   : > { %822 = vmatprep.subr.bf16.mxu1 %v1562_v41 }
  0xa2   : > { %823 = vmatpush1.bf16.msra.mxu1 %v1560_v42 }
  0xa3   : > { %824 = vmatprep.subr.bf16.mxu1 %v1565_v43 }
  0xa6   : > { %825 = vmatpush1.bf16.msra.mxu1 %v1563_v44 }
  0xa7   : > { %826 = vmatprep.subr.bf16.mxu1 %v1568_v45 }
  0xaa   : > { %827 = vmatpush1.bf16.msra.mxu1 %v1566_v46 }
  0xab   : > { %828 = vmatprep.subr.bf16.mxu1 %v1571_v47 }
  0xae   : > { %829 = vmatpush1.bf16.msra.mxu1 %v1569_v48 }
  0xaf   : > { %830 = vmatprep.subr.bf16.mxu1 %v1574_v49 }
  0xb2   : > { %831 = vmatpush1.bf16.msra.mxu1 %v1572_v50 }
  0xb5   : > { %849 = vmatmul.mubr.bf16.vlgmr.msra.gmra.mxu1 %v2019_v7 }
  0xb6   : > { %858 = vmatprep.mubr.bf16.mxu1 %v1816_v39 }
  0xbd   : > { %859 = vmatmul.mubr.bf16.gmra.mxu1 %v2024_v25 }
  0xbe   : > { %868 = vmatprep.mubr.bf16.mxu1 %v1816_v39 }
  0xc5   : > { %869 = vmatmul.mubr.bf16.gmra.mxu1 %v2026_v26 }
  0xc6   : > { %878 = vmatprep.mubr.bf16.mxu1 %v1816_v39 }
  0xcd   : > { %879 = vmatmul.mubr.bf16.gmra.mxu1 %v2032_v32 }
  0xce   : > { %1006 = vmatprep.mubr.bf16.mxu1 %v1816_v39 }
 0x154   : > { %v1385_v51 = vpop.f32.mrf.mxu1 }
 0x155   : > { %v1365_v56 = vpop.f32.mrf.mxu0 }
 0x156   : > { %v565_v52 = vpop.f32.mrf.mxu1 }
 0x157   : > { %v468_v58 = vpop.f32.mrf.mxu0 }
 0x158   : > { %v1386_v53 = vpop.f32.mrf.mxu1 }
 0x159   : > { %v1366_v60 = vpop.f32.mrf.mxu0  ;;  %v599_v2 = vpack.c.bf16 %v1386_v53, %v1385_v51 }
 0x15a   : > { %v568_v54 = vpop.f32.mrf.mxu1  ;;  %v597_v5 = vpack.c.bf16 %v1366_v60, %v1365_v56 }
 0x15b   : > { %v471_v63 = vpop.f32.mrf.mxu0  ;;  %v598_v3 = vpack.c.bf16 %v568_v54, %v565_v52 }
 0x15c   : > { %v1389_v55 = vpop.f32.mrf.mxu1  ;;  %v596_v1 = vpack.c.bf16 %v471_v63, %v468_v58 }
 0x15e   : > { %v581_v57 = vpop.f32.mrf.mxu1  ;;  %1399 = vmatprep.mubr.bf16.mxu0 %v596_v1 }
 0x160   : > { %v1390_v59 = vpop.f32.mrf.mxu1 }
 0x161   : > { %v601_v61 = vpack.c.bf16 %v1390_v59, %v1389_v55 }
 0x162   : > { %v584_v62 = vpop.f32.mrf.mxu1 }
 0x163   : > { %v600_v0 = vpack.c.bf16 %v584_v62, %v581_v57  ;;  %1391 = vmatprep.subr.bf16.mxu0 %v601_v61 }
 0x164   : > { %1392 = vmatpush3.bf16.xpose.msra.mxu0 %v601_v61 }
 0x165   : > { %1393 = vmatprep.subr.bf16.mxu0 %v600_v0 }
 0x16c   : > { %1394 = vmatpush3.bf16.xpose.msra.mxu0 %v600_v0 }
 0x16d   : > { %1395 = vmatprep.subr.bf16.mxu0 %v599_v2 }
 0x174   : > { %1396 = vmatpush3.bf16.xpose.msra.mxu0 %v599_v2 }
 0x175   : > { %1397 = vmatprep.subr.bf16.mxu0 %v598_v3 }
 0x17c   : > { %1398 = vmatpush3.bf16.xpose.msra.mxu0 %v598_v3 }
 0x17d   : > { %1403 = vmatprep.subr.bf16.mxu0 %v1575_v4 }
 0x183   : > { %1400 = vmatmul.mubr.bf16.vlgmr.msra.gmra.mxu0 %v597_v5 }
 0x184   : > { %1404 = vmatpush3.bf16.msra.mxu0 %v1575_v4  ;;  %1419 = vmatprep.mubr.bf16.mxu0 %v2019_v7  ;;  %v850_v7 = vpop.f32.mrf.mxu1 }
 0x185   : > { %1405 = vmatprep.subr.bf16.mxu0 %v1576_v6 }
 0x186   : > { %v852_v14 = vpop.f32.mrf.mxu1 }
 0x188   : > { %1406 = vmatpush3.bf16.msra.mxu0 %v1576_v6  ;;  %v854_v15 = vpop.f32.mrf.mxu1 }
 0x189   : > { %1407 = vmatprep.subr.bf16.mxu0 %v1577_v8  ;;  %v956_v36 = vpack.c.bf16 %v854_v15, %v850_v7 }
 0x18a   : > { %v856_v16 = vpop.f32.mrf.mxu1 }
 0x18b   : > { %v957_v35 = vpack.c.bf16 %v856_v16, %v852_v14 }
 0x18c   : > { %1408 = vmatpush3.bf16.msra.mxu0 %v1577_v8  ;;  %v860_v17 = vpop.f32.mrf.mxu1 }
 0x18d   : > { %1409 = vmatprep.subr.bf16.mxu0 %v1578_v9 }
 0x18e   : > { %v862_v18 = vpop.f32.mrf.mxu1 }
 0x190   : > { %1410 = vmatpush3.bf16.msra.mxu0 %v1578_v9  ;;  %v864_v19 = vpop.f32.mrf.mxu1 }
 0x191   : > { %1411 = vmatprep.subr.bf16.mxu0 %v1579_v10  ;;  %v959_v34 = vpack.c.bf16 %v864_v19, %v860_v17 }
 0x192   : > { %v866_v20 = vpop.f32.mrf.mxu1 }
 0x193   : > { %v960_v33 = vpack.c.bf16 %v866_v20, %v862_v18 }
 0x194   : > { %1412 = vmatpush3.bf16.msra.mxu0 %v1579_v10  ;;  %v870_v21 = vpop.f32.mrf.mxu1 }
 0x195   : > { %1413 = vmatprep.subr.bf16.mxu0 %v1580_v11 }
 0x196   : > { %v872_v22 = vpop.f32.mrf.mxu1 }
 0x198   : > { %1414 = vmatpush3.bf16.msra.mxu0 %v1580_v11  ;;  %v874_v23 = vpop.f32.mrf.mxu1 }
 0x199   : > { %1415 = vmatprep.subr.bf16.mxu0 %v1581_v12 }
 0x19a   : > { %v876_v24 = vpop.f32.mrf.mxu1 }
 0x19c   : > { %1416 = vmatpush3.bf16.msra.mxu0 %v1581_v12  ;;  %v880_v27 = vpop.f32.mrf.mxu1 }
 0x19d   : > { %1417 = vmatprep.subr.bf16.mxu0 %v1582_v13 }
 0x19e   : > { %v882_v28 = vpop.f32.mrf.mxu1 }
 0x1a0   : > { %1418 = vmatpush3.bf16.msra.mxu0 %v1582_v13  ;;  %v884_v29 = vpop.f32.mrf.mxu1 }
 0x1a2   : > { %v886_v30 = vpop.f32.mrf.mxu1 }
 0x1a3   : > { %1420 = vmatmul.mubr.bf16.vlgmr.msra.gmra.mxu0 %v2024_v25  ;;  %v965_v25 = vpack.c.bf16 %v884_v29, %v880_v27  ;;  %v966_v31 = vpack.c.bf16 %v886_v30, %v882_v28 }
 0x1a4   : > { %1423 = vmatprep.mubr.bf16.mxu0 %v2026_v26  ;;  %v963_v26 = vpack.c.bf16 %v876_v24, %v872_v22 }
 0x1a5   : > { %982 = vmatprep.subr.bf16.mxu1 %v966_v31 }
 0x1a6   : > { %983 = vmatpush1.bf16.msra.mxu1 %v965_v25 }
 0x1a7   : > { %984 = vmatprep.subr.bf16.mxu1 %v963_v26 }
 0x1ab   : > { %1424 = vmatmul.mubr.bf16.gmra.mxu0 %v2032_v32  ;;  %v962_v32 = vpack.c.bf16 %v874_v23, %v870_v21 }
 0x1ad   : > { %985 = vmatpush1.bf16.msra.mxu1 %v962_v32 }
 0x1ae   : > { %986 = vmatprep.subr.bf16.mxu1 %v960_v33 }
 0x1b1   : > { %987 = vmatpush1.bf16.msra.mxu1 %v959_v34 }
 0x1b2   : > { %988 = vmatprep.subr.bf16.mxu1 %v957_v35 }
 0x1b5   : > { %989 = vmatpush1.bf16.msra.mxu1 %v956_v36 }
 0x243   : > { %v1401_v37 = vpop.f32.mrf.mxu0 }
 0x244   : > { %v658_v38 = vsel %vm651_vm0, %v1401_v37, -inf }
 0x245   : > { %659 = vmax.xlane.f32.xlu1 %v658_v38  ;;  %v636_v40 = vpop.f32.mrf.mxu0 }
 0x246   : > { %v652_v41 = vsel %vm651_vm0, %v636_v40, -inf }
 0x247   : > { %653 = vmax.xlane.f32.xlu0 %v652_v41  ;;  %v1402_v42 = vpop.f32.mrf.mxu0 }
 0x248   : > { %v661_v43 = vsel %vm651_vm0, %v1402_v42, -inf }
 0x249   : > { %662 = vmax.xlane.f32.xlu1 %v661_v43  ;;  %v639_v44 = vpop.f32.mrf.mxu0 }
 0x24a   : > { %v655_v45 = vsel %vm651_vm0, %v639_v44, -inf }
 0x24b   : > { %656 = vmax.xlane.f32.xlu0 %v655_v45 }
 0x263   : > { %v1421_v46 = vpop.f32.mrf.mxu0 }
 0x265   : > { %v923_v47 = vpop.f32.mrf.mxu0 }
 0x267   : > { %v1422_v48 = vpop.f32.mrf.mxu0 }
 0x268   : > { %v961_v56 = vpack.c.bf16 %v1422_v48, %v1421_v46 }
 0x269   : > { %v926_v49 = vpop.f32.mrf.mxu0 }
 0x26a   : > { %v958_v57 = vpack.c.bf16 %v926_v49, %v923_v47 }
 0x26b   : > { %v1425_v50 = vpop.f32.mrf.mxu0 }
 0x26d   : > { %v939_v51 = vpop.f32.mrf.mxu0 }
 0x26f   : > { %v1426_v52 = vpop.f32.mrf.mxu0 }
 0x270   : > { %v967_v53 = vpack.c.bf16 %v1426_v52, %v1425_v50 }
 0x271   : > { %v942_v54 = vpop.f32.mrf.mxu0 }
 0x272   : > { %1427 = vmatprep.subr.bf16.mxu0 %v967_v53  ;;  %v964_v55 = vpack.c.bf16 %v942_v54, %v939_v51 }
 0x273   : > { %1428 = vmatpush3.bf16.msra.mxu0 %v967_v53 }
 0x274   : > { %1429 = vmatprep.subr.bf16.mxu0 %v964_v55 }
 0x277   : > { %1430 = vmatpush3.bf16.msra.mxu0 %v964_v55 }
 0x278   : > { %1431 = vmatprep.subr.bf16.mxu0 %v961_v56 }
 0x27b   : > { %1432 = vmatpush3.bf16.msra.mxu0 %v961_v56 }
 0x27c   : > { %1433 = vmatprep.subr.bf16.mxu0 %v958_v57 }
 0x27f   : > { %1434 = vmatpush3.bf16.msra.mxu0 %v958_v57 }
 0x2ce   : > { %v660_v58 = vpop.xlane.xlu1 %659 }
 0x2cf   : > { %v666_v59 = vsub.f32 %v1401_v37, %v660_v58 }
 0x2d0   : > { %v654_v60 = vpop.xlane.xlu0 %653 }
 0x2d1   : > { %v664_v61 = vsub.f32 %v636_v40, %v654_v60  ;;  %v672_v63 = vmul.f32 1.442695, %v666_v59 }
 0x2d2   : > { %v663_v62 = vpop.xlane.xlu1 %662 }
 0x2d3   : > { %v668_v0 = vmul.f32 1.442695, %v664_v61  ;;  %v667_v1 = vsub.f32 %v1402_v42, %v663_v62 }
 0x2d4   : > { %v657_v2 = vpop.xlane.xlu0 %656 }
 0x2d5   : > { %1583 = vpow2.f32 %v668_v0  ;;  %v674_v3 = vmul.f32 1.442695, %v667_v1  ;;  %v665_v4 = vsub.f32 %v639_v44, %v657_v2 }
 0x2d6   : > { %1585 = vpow2.f32 %v672_v63 }
 0x2d7   : > { %v670_v5 = vmul.f32 1.442695, %v665_v4  ;;  %1587 = vpow2.f32 %v674_v3 }
 0x2d9   : > { %1589 = vpow2.f32 %v670_v5 }
 0x2e2   : > { %v1584_v6 = vpop.eup %1583 }
 0x2e3   : > { %v676_v8 = vsel %vm651_vm0, %v1584_v6, 0.0  ;;  %v1586_v9 = vpop.eup %1585 }
 0x2e4   : > { %677 = vadd.xlane.f32.xlu0 %v676_v8  ;;  %v1588_v10 = vpop.eup %1587  ;;  %v682_v13 = vsel %vm651_vm0, %v1586_v9, 0.0 }
 0x2e5   : > { %v955_v14 = vpack.c.bf16 %v1588_v10, %v1586_v9  ;;  %v685_v15 = vsel %vm651_vm0, %v1588_v10, 0.0 }
 0x2e6   : > { %v1590_v11 = vpop.eup %1589 }
 0x2e7   : > { %v954_v12 = vpack.c.bf16 %v1590_v11, %v1584_v6  ;;  %v679_v7 = vsel %vm651_vm0, %v1590_v11, 0.0 }
 0x2e8   : > { %683 = vadd.xlane.f32.xlu0 %v682_v13  ;;  %680 = vadd.xlane.f32.xlu1 %v679_v7 }
 0x2e9   : > { %1290 = vmatmul.mubr.msk.bf16.vlgmr.msra.gmra.mxu1 %vm651_vm0, %v954_v12  ;;  %1435 = vmatprep.mubr.msk.bf16.mxu0 %vm651_vm0, %v954_v12 }
 0x2ea   : > { %1436 = vmatmul.mubr.msk.bf16.vlgmr.msra.gmra.mxu0 %vm651_vm0, %v955_v14  ;;  %1016 = vmatprep.mubr.bf16.mxu1 %v1816_v39 }
 0x2ec   : > { %686 = vadd.xlane.f32.xlu1 %v685_v15 }
 0x2f1   : > { %1291 = vmatmul.mubr.msk.bf16.gmra.mxu1 %vm651_vm0, %v955_v14 }
 0x36d   : > { %v678_v16 = vpop.xlane.xlu0 %677 }
 0x36e   : > { %1591 = vrcp.f32 %v678_v16 }
 0x371   : > { %v681_v17 = vpop.xlane.xlu1 %680  ;;  %v684_v18 = vpop.xlane.xlu0 %683 }
 0x372   : > { %1593 = vrcp.f32 %v681_v17 }
 0x373   : > { %1595 = vrcp.f32 %v684_v18 }
 0x375   : > { %v687_v27 = vpop.xlane.xlu1 %686 }
 0x376   : > { %1597 = vrcp.f32 %v687_v27 }
 0x37b   : > { %v1592_v34 = vpop.eup %1591 }
 0x37f   : > { %v1594_v44 = vpop.eup %1593 }
 0x380   : > { %v1596_v53 = vpop.eup %1595 }
 0x383   : > { %v1598_v58 = vpop.eup %1597 }
 0x3a9   : > { %v1008_v19 = vpop.f32.mrf.mxu1 }
 0x3aa   : > { %v1437_v20 = vpop.f32.mrf.mxu0  ;;  %v1076_v22 = vmax.f32 %v1008_v19, 0.0 }
 0x3ab   : > { %v1010_v21 = vpop.f32.mrf.mxu1  ;;  %v1090_v46 = vmax.f32 %v1437_v20, 0.0 }
 0x3ac   : > { %v1080_v23 = vmax.f32 %v1010_v21, 0.0  ;;  %v1061_v24 = vpop.f32.mrf.mxu0 }
 0x3ad   : > { %v1088_v28 = vmax.f32 %v1061_v24, 0.0  ;;  %v1012_v39 = vpop.f32.mrf.mxu1 }
 0x3ae   : > { %v1084_v29 = vadd.f32 %v1080_v23, %v1076_v22  ;;  %v1438_v25 = vpop.f32.mrf.mxu0  ;;  %v1077_v31 = vmax.f32 %v1012_v39, 0.0 }
 0x3af   : > { %v1014_v30 = vpop.f32.mrf.mxu1  ;;  %v1091_v54 = vmax.f32 %v1438_v25, 0.0 }
 0x3b0   : > { %v1092_v26 = vadd.f32 %v1088_v28, %v1084_v29  ;;  %v1081_v32 = vmax.f32 %v1014_v30, 0.0  ;;  %v1064_v33 = vpop.f32.mrf.mxu0 }
 0x3b1   : > { %v1089_v35 = vmax.f32 %v1064_v33, 0.0  ;;  %v1018_v36 = vpop.f32.mrf.mxu1 }
 0x3b2   : > { %v1100_v37 = vmul.f32 %v1592_v34, %v1092_v26  ;;  %v1085_v38 = vadd.f32 %v1081_v32, %v1077_v31  ;;  %v1078_v42 = vmax.f32 %v1018_v36, 0.0 }
 0x3b3   : > { %v1020_v40 = vpop.f32.mrf.mxu1 }
 0x3b4   : > { %1104 = vst [vmem:[%s300_s24] sm:$0xff] %v1100_v37  ;;  %v1093_v41 = vadd.f32 %v1089_v35, %v1085_v38  ;;  %v1082_v43 = vmax.f32 %v1020_v40, 0.0 }
 0x3b5   : > { %v1022_v45 = vpop.f32.mrf.mxu1 }
 0x3b6   : > { %v1101_v47 = vmul.f32 %v1594_v44, %v1093_v41  ;;  %v1086_v48 = vadd.f32 %v1082_v43, %v1078_v42  ;;  %v1079_v51 = vmax.f32 %v1022_v45, 0.0 }
 0x3b7   : > { %v1024_v49 = vpop.f32.mrf.mxu1 }
 0x3b8   : > { %1105 = vst [vmem:[%s300_s24 + $0x8] sm:$0xff] %v1101_v47  ;;  %v1094_v50 = vadd.f32 %v1090_v46, %v1086_v48  ;;  %v1083_v52 = vmax.f32 %v1024_v49, 0.0 }
 0x3ba   : > { %v1102_v55 = vmul.f32 %v1596_v53, %v1094_v50  ;;  %v1087_v56 = vadd.f32 %v1083_v52, %v1079_v51 }
 0x3bc   : > { %1106 = vst [vmem:[%s300_s24 + $0x10] sm:$0xff] %v1102_v55  ;;  %v1095_v57 = vadd.f32 %v1091_v54, %v1087_v56 }
 0x3be   : > { %v1103_v59 = vmul.f32 %v1598_v58, %v1095_v57 }
 0x3c0   : > { %1107 = vst [vmem:[%s300_s24 + $0x18] sm:$0xff] %v1103_v59 }
 0x3c1   : > { %1744 = shalt.err (!%p1741_p13)
}
 0x3c2   : > { %s1745_s17 = scalar_lea.hbm %s2069_s14, 512  ;;  %s1749_s28 = scalar_lea.hbm %s2117_s5, 1024 }
 0x3c3   : > { %p1746_p6 = scmp.ne.s32.totalorder %s2069_s14, %s1745_s17  ;;  %p1750_p7 = scmp.lt.s32.totalorder %s2069_s14, %s2117_s5 }
 0x3c4   : > { %p1751_p11 = scmp.lt.s32.totalorder %s1749_s28, %s1745_s17 }
 0x3c5   : > { %p1747_p4 = pnand %p1746_p6, %p2137_p10 }
 0x3c6   : > { %p1752_p2 = por %p1751_p11, %p1750_p7 }
 0x3c7   : > { %p1748_p8 = pneg %p1747_p4 }
 0x3c9   : > { %p1753_p12 = pnand %p1752_p2, %p1748_p8 }
 0x3cb   : > { %1756 = shalt.err (!%p1753_p12)
}
 0x3cc   : > { %s1818_s9 = smov 128   ;;  %s1819_s10 = smov 8  }
 0x3cd   : > { %1457 = dma.vmem_to_hbm [thread:$0]  (%p2137_p10), %s2064_s26, 512, %s2069_s14, %s1109_s6, %s1818_s9, %s1818_s9, %s1819_s10  }
 0x3ce PF: > { %s1137_s12 = sand.u32 1, %s1791_s18   ;;  %p2138_p0 = scmp.ne.s32.totalorder %s2124_s25, 0 }
 0x3cf   : > { %p2139_p3 = scmp.ge.s32.totalorder %s1803_s21, 2  ;;  %s1138_s7 = scalar_lea.sflag [#allocation4], %s1137_s12 }
 0x3d1   : > { %p1477_p5 = pnand %p2139_p3, %p2138_p0 }
 0x3d3   : > { %p1478_p9 = pneg %p1477_p5 }
 0x3d5   : > { %1786 = dma.done.wait (%p1478_p9), %s1138_s7, 512  }
 0x3d6   : > { %1788 = vsyncadd (%p1478_p9), %s1138_s7, 4294966784  ;;  %p20_p1 = scmp.ge.s32.totalorder %s1941_s15, 4   ;;  %s2140_s18 = smov %s1795_s19 }
 0x3d7   : > { %s2141_s19 = smov %s1799_s20  ;;  %s2142_s20 = smov %s1950_s23 }
 0x3d8   : > { %s2143_s21 = smov %s1941_s15  ;;  %22 = sbr.rel (!%p20_p1) target bundleno = 7 (0x7), region = 101 }
 0x3dd   :  { %1143 = vsyncpa [#allocation3], 1 }
 0x3de   :  { %1145 = vsyncpa [#allocation3 + $0x1], 1 }
 0x3df   :  { %1146 = vsyncpa [#allocation6], 1 }
 0x3e0   :  { %1147 = vsyncpa [#allocation9], 1 }
 0x3e1   :  { %1148 = vsyncpa [#allocation4], 1 }
 0x3e2   :  { %1150 = vsyncpa [#allocation4 + $0x1], 1 }

</bundles_post_ra>
